<compile_context>
chip_gen: v5e
topology: v5e:2x2
jax: 0.10.0
libtpu: 0.0.40
codegen_flags: <defaults>
</compile_context>

<pallas_src>
import jax
import jax.numpy as jnp
from jax.experimental import pallas as pl
from jax.experimental.pallas import tpu as pltpu

_LANES = 128
_SUBLANES = 8


def _round_up(x, m):
    return ((x + m - 1) // m) * m


def _cdiv(a, b):
    return -(-a // b)


def _tversky_partial_kernel(logits_ref, mask_ref, spm_ref, sp_ref, sm_ref):
    """Accumulates per-lane partial sums of pred*m, pred, m for one shard."""
    j = pl.program_id(1)

    @pl.when(j == 0)
    def _():
        spm_ref[...] = jnp.zeros_like(spm_ref)
        sp_ref[...] = jnp.zeros_like(sp_ref)
        sm_ref[...] = jnp.zeros_like(sm_ref)

    pred = jax.nn.sigmoid(logits_ref[...].astype(jnp.float32))  # (B, tr, 128)
    m = mask_ref[...].astype(jnp.float32)                       # (B, tr, 128)

    # Reduce only the row (sublane) axis per step; lanes stay dense.  The one
    # cross-lane reduction happens a single time outside the kernel.
    spm_ref[...] += jnp.sum(pred * m, axis=1)[None]
    sp_ref[...] += jnp.sum(pred, axis=1)[None]
    sm_ref[...] += jnp.sum(m, axis=1)[None]


def tversky_loss(logits, mask, smooth=1.0, alpha=0.7, reduction="avg",
                 block_rows=None, n_split=2):
    """Pallas implementation of TverskyLoss.forward (logits, mask both NCHW).

    Inputs may be any float dtype for logits (e.g. bf16) and any numeric dtype
    for mask (e.g. int8/bool); compute is f32 in-kernel.
    """
    smooth = float(smooth)
    alpha = float(alpha)

    b = logits.shape[0]
    logits2d = logits.reshape(b, -1)
    mask2d = mask.reshape(b, -1)
    n = logits2d.shape[1]

    r_total = _cdiv(n, _LANES)  # number of 128-lane rows per batch element

    # Only shard the reduction across cores if each shard gets at least one
    # sublane-aligned (8-row) tile.
    if r_total < n_split * _SUBLANES:
        n_split = 1
    rows_per_split = _cdiv(r_total, n_split)

    in_itemsize = logits2d.dtype.itemsize + mask2d.dtype.itemsize

    if block_rows is None:
        # ~2 MiB of input (both operands combined) per grid step.
        block_rows = max(_SUBLANES, (2 << 20) // (b * _LANES * in_itemsize))
    # Cap so 2 inputs x 2 double-buffers stays well inside v7x's 64 MiB VMEM.
    max_rows = max(_SUBLANES, (40 << 20) // (2 * b * _LANES * in_itemsize))
    block_rows = min(block_rows, max_rows)

    tile_rows = min(_round_up(block_rows, _SUBLANES),
                    _round_up(rows_per_split, _SUBLANES))
    tiles_per_split = _cdiv(rows_per_split, tile_rows)
    r_padded = n_split * tiles_per_split * tile_rows
    n_padded = r_padded * _LANES

    if n_padded != n:
        pad = n_padded - n
        # logits = -1e30 -> sigmoid == 0, mask = 0: padding contributes exactly
        # zero to every partial sum.
        logits2d = jnp.pad(logits2d, ((0, 0), (0, pad)), constant_values=-1e30)
        mask2d = jnp.pad(mask2d, ((0, 0), (0, pad)), constant_values=0)

    logits3d = logits2d.reshape(b, r_padded, _LANES)
    mask3d = mask2d.reshape(b, r_padded, _LANES)

    in_block = (b, tile_rows, _LANES)
    out_block = (1, b, _LANES)

    def in_index(s, j):
        return (0, s * tiles_per_split + j, 0)

    def out_index(s, j):
        return (s, 0, 0)

    # Explicit scoped-VMEM budget: double-buffered input tiles + outputs + slack.
    tile_in_bytes = b * tile_rows * _LANES * in_itemsize
    vmem_bytes = 2 * tile_in_bytes + 6 * b * _LANES * 4 + (4 << 20)
    vmem_limit = int(min(max(vmem_bytes, 32 << 20), 64 << 20))

    out_shape = jax.ShapeDtypeStruct((n_split, b, _LANES), jnp.float32)
    out_spec = pl.BlockSpec(out_block, out_index)

    s_pm, s_p, s_m = pl.pallas_call(
        _tversky_partial_kernel,
        out_shape=(out_shape, out_shape, out_shape),
        grid_spec=pltpu.PrefetchScalarGridSpec(
            num_scalar_prefetch=0,
            grid=(n_split, tiles_per_split),
            in_specs=[
                pl.BlockSpec(in_block, in_index),
                pl.BlockSpec(in_block, in_index),
            ],
            out_specs=(out_spec, out_spec, out_spec),
        ),
        compiler_params=pltpu.CompilerParams(
            dimension_semantics=("parallel", "arbitrary"),
            vmem_limit_bytes=vmem_limit,
        ),
    )(logits3d, mask3d)

    # Tiny epilogue (O(B) work): cross-lane / cross-split reduction, algebraic
    # recovery of fp/fn from the fused sums, and the Tversky ratio.
    tp = jnp.sum(s_pm, axis=(0, 2))
    fp = jnp.sum(s_p, axis=(0, 2)) - tp
    fn = jnp.sum(s_m, axis=(0, 2)) - tp
    loss = 1.0 - (tp + smooth) / (tp + alpha * fp + (1.0 - alpha) * fn + smooth)

    if reduction == "avg":
        return jnp.mean(loss)
    if reduction == "sum":
        return jnp.sum(loss)
    return loss


def _reference(logits, mask, smooth=1.0, alpha=0.7, reduction="avg"):
    b = logits.shape[0]
    pred = jax.nn.sigmoid(logits.astype(jnp.float32)).reshape(b, -1)
    m = mask.astype(jnp.float32).reshape(b, -1)
    tp = jnp.sum(pred * m, axis=1)
    fp = jnp.sum(pred * (1 - m), axis=1)
    fn = jnp.sum((1 - pred) * m, axis=1)
    loss = 1 - (tp + smooth) / (tp + alpha * fp + (1 - alpha) * fn + smooth)
    if reduction == "avg":
        return jnp.mean(loss)
    if reduction == "sum":
        return jnp.sum(loss)
    return loss


if __name__ == "__main__":
    key = jax.random.PRNGKey(0)
    k1, k2, k3, k4, k5, k6 = jax.random.split(key, 6)

    # Case 1: small NCHW f32 (single reduction shard), 'avg' reduction.
    logits1 = jax.random.normal(k1, (2, 4, 16, 16), dtype=jnp.float32)
    mask1 = (jax.random.uniform(k2, (2, 4, 16, 16)) > 0.5).astype(jnp.float32)
    out1 = jax.block_until_ready(tversky_loss(logits1, mask1, reduction="avg"))
    ref1 = _reference(logits1, mask1, reduction="avg")
    assert jnp.allclose(out1, ref1, atol=1e-5, rtol=1e-5), (out1, ref1)

    # Case 2: bf16 logits + int8 mask (halved HBM traffic), 2-way core split.
    logits2 = jax.random.normal(k3, (2, 8, 16, 16), dtype=jnp.bfloat16)
    mask2 = (jax.random.uniform(k4, (2, 8, 16, 16)) > 0.5).astype(jnp.int8)
    out2 = jax.block_until_ready(tversky_loss(logits2, mask2, reduction="sum"))
    ref2 = _reference(logits2, mask2, reduction="sum")
    assert jnp.allclose(out2, ref2, atol=1e-4, rtol=1e-4), (out2, ref2)

    # Case 3: non-128-aligned N exercises the padding path, 'none' reduction.
    logits3 = jax.random.normal(k5, (2, 3, 17, 17), dtype=jnp.float32)
    mask3 = (jax.random.uniform(k6, (2, 3, 17, 17)) > 0.5).astype(jnp.float32)
    out3 = jax.block_until_ready(tversky_loss(logits3, mask3, reduction="none"))
    ref3 = _reference(logits3, mask3, reduction="none")
    assert jnp.allclose(out3, ref3, atol=1e-5, rtol=1e-5), (out3, ref3)

    print("KERNEL_OK")
</pallas_src>

<mosaic_0001>
module attributes {stable_mosaic.version = 11 : i64} {
  func.func @_tversky_partial_kernel(%arg0: i32, %arg1: i32, %arg2: memref<2x8x128xf32, #tpu.memory_space<vmem>>, %arg3: memref<2x8x128xf32, #tpu.memory_space<vmem>>, %arg4: memref<1x2x128xf32, #tpu.memory_space<vmem>>, %arg5: memref<1x2x128xf32, #tpu.memory_space<vmem>>, %arg6: memref<1x2x128xf32, #tpu.memory_space<vmem>>) attributes {dimension_semantics = [#tpu.dimension_semantics<parallel>, #tpu.dimension_semantics<arbitrary>], iteration_bounds = array<i64: 1, 1>, scalar_prefetch = 0 : i64, scratch_operands = 0 : i64, tpu.core_type = #tpu.core_type<tc>, window_params = [{transform_indices = @transform_0, window_bounds = array<i64: 2, 8, 128>}, {transform_indices = @transform_1, window_bounds = array<i64: 2, 8, 128>}, {transform_indices = @transform_2, window_bounds = array<i64: 1, 2, 128>}, {transform_indices = @transform_3, window_bounds = array<i64: 1, 2, 128>}, {transform_indices = @transform_4, window_bounds = array<i64: 1, 2, 128>}]} {
    %c0_i32 = arith.constant 0 : i32
    %0 = arith.cmpi eq, %arg1, %c0_i32 : i32
    %1 = arith.extui %0 : i1 to i32
    %c0_i32_0 = arith.constant 0 : i32
    %2 = arith.cmpi ne, %1, %c0_i32_0 : i32
    scf.if %2 {
      %cst_27 = arith.constant 0.000000e+00 : f32
      %26 = vector.broadcast %cst_27 : f32 to vector<1x2x128xf32>
      %c0_28 = arith.constant 0 : index
      %c0_29 = arith.constant 0 : index
      %c0_30 = arith.constant 0 : index
      %27 = vector.load %arg4[%c0_28, %c0_29, %c0_30] : memref<1x2x128xf32, #tpu.memory_space<vmem>>, vector<1x2x128xf32>
      tpu.vector_store %arg4[%c0_28, %c0_29, %c0_30], %26 {strides = array<i32>} : memref<1x2x128xf32, #tpu.memory_space<vmem>>, vector<1x2x128xf32>,
      %cst_31 = arith.constant 0.000000e+00 : f32
      %28 = vector.broadcast %cst_31 : f32 to vector<1x2x128xf32>
      %c0_32 = arith.constant 0 : index
      %c0_33 = arith.constant 0 : index
      %c0_34 = arith.constant 0 : index
      %29 = vector.load %arg5[%c0_32, %c0_33, %c0_34] : memref<1x2x128xf32, #tpu.memory_space<vmem>>, vector<1x2x128xf32>
      tpu.vector_store %arg5[%c0_32, %c0_33, %c0_34], %28 {strides = array<i32>} : memref<1x2x128xf32, #tpu.memory_space<vmem>>, vector<1x2x128xf32>,
      %cst_35 = arith.constant 0.000000e+00 : f32
      %30 = vector.broadcast %cst_35 : f32 to vector<1x2x128xf32>
      %c0_36 = arith.constant 0 : index
      %c0_37 = arith.constant 0 : index
      %c0_38 = arith.constant 0 : index
      %31 = vector.load %arg6[%c0_36, %c0_37, %c0_38] : memref<1x2x128xf32, #tpu.memory_space<vmem>>, vector<1x2x128xf32>
      tpu.vector_store %arg6[%c0_36, %c0_37, %c0_38], %30 {strides = array<i32>} : memref<1x2x128xf32, #tpu.memory_space<vmem>>, vector<1x2x128xf32>,
    } else {
    }
    %c0 = arith.constant 0 : index
    %c0_1 = arith.constant 0 : index
    %c0_2 = arith.constant 0 : index
    %3 = vector.load %arg2[%c0, %c0_1, %c0_2] : memref<2x8x128xf32, #tpu.memory_space<vmem>>, vector<2x8x128xf32>
    %4 = arith.negf %3 : vector<2x8x128xf32>
    %5 = math.exp %4 : vector<2x8x128xf32>
    %cst = arith.constant 1.000000e+00 : f32
    %6 = vector.broadcast %cst : f32 to vector<2x8x128xf32>
    %7 = arith.addf %6, %5 : vector<2x8x128xf32>
    %8 = arith.divf %6, %7 : vector<2x8x128xf32>
    %c0_3 = arith.constant 0 : index
    %c0_4 = arith.constant 0 : index
    %c0_5 = arith.constant 0 : index
    %9 = vector.load %arg3[%c0_3, %c0_4, %c0_5] : memref<2x8x128xf32, #tpu.memory_space<vmem>>, vector<2x8x128xf32>
    %c0_6 = arith.constant 0 : index
    %c0_7 = arith.constant 0 : index
    %c0_8 = arith.constant 0 : index
    %10 = vector.load %arg4[%c0_6, %c0_7, %c0_8] : memref<1x2x128xf32, #tpu.memory_space<vmem>>, vector<1x2x128xf32>
    %11 = arith.mulf %8, %9 : vector<2x8x128xf32>
    %cst_9 = arith.constant dense<0.000000e+00> : vector<2x128xf32>
    %12 = vector.multi_reduction <add>, %11, %cst_9 [1] : vector<2x8x128xf32> to vector<2x128xf32>
    %13 = vector.shape_cast %12 : vector<2x128xf32> to vector<1x2x128xf32>
    %14 = arith.addf %10, %13 : vector<1x2x128xf32>
    %c0_10 = arith.constant 0 : index
    %c0_11 = arith.constant 0 : index
    %c0_12 = arith.constant 0 : index
    %15 = vector.load %arg4[%c0_10, %c0_11, %c0_12] : memref<1x2x128xf32, #tpu.memory_space<vmem>>, vector<1x2x128xf32>
    tpu.vector_store %arg4[%c0_10, %c0_11, %c0_12], %14 {strides = array<i32>} : memref<1x2x128xf32, #tpu.memory_space<vmem>>, vector<1x2x128xf32>,
    %c0_13 = arith.constant 0 : index
    %c0_14 = arith.constant 0 : index
    %c0_15 = arith.constant 0 : index
    %16 = vector.load %arg5[%c0_13, %c0_14, %c0_15] : memref<1x2x128xf32, #tpu.memory_space<vmem>>, vector<1x2x128xf32>
    %cst_16 = arith.constant dense<0.000000e+00> : vector<2x128xf32>
    %17 = vector.multi_reduction <add>, %8, %cst_16 [1] : vector<2x8x128xf32> to vector<2x128xf32>
    %18 = vector.shape_cast %17 : vector<2x128xf32> to vector<1x2x128xf32>
    %19 = arith.addf %16, %18 : vector<1x2x128xf32>
    %c0_17 = arith.constant 0 : index
    %c0_18 = arith.constant 0 : index
    %c0_19 = arith.constant 0 : index
    %20 = vector.load %arg5[%c0_17, %c0_18, %c0_19] : memref<1x2x128xf32, #tpu.memory_space<vmem>>, vector<1x2x128xf32>
    tpu.vector_store %arg5[%c0_17, %c0_18, %c0_19], %19 {strides = array<i32>} : memref<1x2x128xf32, #tpu.memory_space<vmem>>, vector<1x2x128xf32>,
    %c0_20 = arith.constant 0 : index
    %c0_21 = arith.constant 0 : index
    %c0_22 = arith.constant 0 : index
    %21 = vector.load %arg6[%c0_20, %c0_21, %c0_22] : memref<1x2x128xf32, #tpu.memory_space<vmem>>, vector<1x2x128xf32>
    %cst_23 = arith.constant dense<0.000000e+00> : vector<2x128xf32>
    %22 = vector.multi_reduction <add>, %9, %cst_23 [1] : vector<2x8x128xf32> to vector<2x128xf32>
    %23 = vector.shape_cast %22 : vector<2x128xf32> to vector<1x2x128xf32>
    %24 = arith.addf %21, %23 : vector<1x2x128xf32>
    %c0_24 = arith.constant 0 : index
    %c0_25 = arith.constant 0 : index
    %c0_26 = arith.constant 0 : index
    %25 = vector.load %arg6[%c0_24, %c0_25, %c0_26] : memref<1x2x128xf32, #tpu.memory_space<vmem>>, vector<1x2x128xf32>
    tpu.vector_store %arg6[%c0_24, %c0_25, %c0_26], %24 {strides = array<i32>} : memref<1x2x128xf32, #tpu.memory_space<vmem>>, vector<1x2x128xf32>,
    return
  }
  func.func @transform_0(%arg0: i32, %arg1: i32) -> (i32, i32, i32) {
    %c1_i32 = arith.constant 1 : i32
    %0 = arith.muli %arg0, %c1_i32 : i32
    %1 = arith.addi %0, %arg1 : i32
    %c0_i32 = arith.constant 0 : i32
    %c0_i32_0 = arith.constant 0 : i32
    %c0_i32_1 = arith.constant 0 : i32
    return %c0_i32, %1, %c0_i32_0 : i32, i32, i32
  }
  func.func @transform_1(%arg0: i32, %arg1: i32) -> (i32, i32, i32) {
    %c1_i32 = arith.constant 1 : i32
    %0 = arith.muli %arg0, %c1_i32 : i32
    %1 = arith.addi %0, %arg1 : i32
    %c0_i32 = arith.constant 0 : i32
    %c0_i32_0 = arith.constant 0 : i32
    %c0_i32_1 = arith.constant 0 : i32
    return %c0_i32, %1, %c0_i32_0 : i32, i32, i32
  }
  func.func @transform_2(%arg0: i32, %arg1: i32) -> (i32, i32, i32) {
    %c0_i32 = arith.constant 0 : i32
    %c0_i32_0 = arith.constant 0 : i32
    %c0_i32_1 = arith.constant 0 : i32
    return %arg0, %c0_i32, %c0_i32_0 : i32, i32, i32
  }
  func.func @transform_3(%arg0: i32, %arg1: i32) -> (i32, i32, i32) {
    %c0_i32 = arith.constant 0 : i32
    %c0_i32_0 = arith.constant 0 : i32
    %c0_i32_1 = arith.constant 0 : i32
    return %arg0, %c0_i32, %c0_i32_0 : i32, i32, i32
  }
  func.func @transform_4(%arg0: i32, %arg1: i32) -> (i32, i32, i32) {
    %c0_i32 = arith.constant 0 : i32
    %c0_i32_0 = arith.constant 0 : i32
    %c0_i32_1 = arith.constant 0 : i32
    return %arg0, %c0_i32, %c0_i32_0 : i32, i32, i32
  }
}

</mosaic_0001>

<bundles_post_ra>
// kernel: tpu_custom_call.1
= control target key start
LH: loop header
LB: loop body
LE: loop exit
PB: predicated region body
PF: predicated region fallthrough
CT: control target
= control target key end

     0   :  { %10 = vsyncpa [#allocation3], 0  ;;  %s411_s0 = inlined_call_operand.hbm [shape: f32[2,8,128], index: 0, kind: input, shape index: {}]   ;;  %s412_s1 = inlined_call_operand.hbm [shape: f32[2,8,128], index: 1, kind: input, shape index: {}]   ;;  %s413_s2 = inlined_call_operand.hbm [shape: f32[1,2,128], index: 2, kind: output, shape index: {0}]   ;;  %s414_s3 = inlined_call_operand.hbm [shape: f32[1,2,128], index: 3, kind: output, shape index: {1}]   ;;  %s415_s4 = inlined_call_operand.hbm [shape: f32[1,2,128], index: 4, kind: output, shape index: {2}]  }
   0x1   :  { %11 = vsyncpa [#allocation6], 0 }
   0x2   :  { %12 = vsyncpa [#allocation4], 0 }
   0x3   :  { %13 = vsyncpa [#allocation9], 0  ;;  %s21_s17 = sshll.u32 %s411_s0, 4  ;;  %s360_s18 = smov [#allocation2]   ;;  %s22_s17 = int_to_ptr.hbm [resolvable:$true] %s21_s17 }
   0x4   :  { %s23_s19 = sshll.u32 %s360_s18, 4  ;;  %s37_s22 = sshll.u32 %s412_s1, 4  ;;  %s24_s19 = int_to_ptr.vmem [resolvable:$true] %s23_s19  ;;  %s38_s22 = int_to_ptr.hbm [resolvable:$true] %s37_s22 }
   0x5   :  { %s361_s23 = smov 128   ;;  %s362_s24 = smov 8  }
   0x6   :  { %29 = dma.hbm_to_vmem [thread:$0]  %s22_s17, 256, %s24_s19, [#allocation3], %s361_s23, %s361_s23, %s362_s24  }
   0x7   :  { %s363_s25 = smov [#allocation5]  }
   0x8   :  { %s39_s26 = sshll.u32 %s363_s25, 4  ;;  %s40_s26 = int_to_ptr.vmem [resolvable:$true] %s39_s26 }
   0x9   :  { %45 = dma.hbm_to_vmem [thread:$0]  %s38_s22, 256, %s40_s26, [#allocation6], %s361_s23, %s361_s23, %s362_s24  }
   0xa   :  { %352 = dma.done.wait [#allocation3], 256  }
   0xb   :  { %353 = vsyncadd [#allocation3], 4294967040 }
   0xc   :  { %354 = dma.done.wait [#allocation6], 256  }
   0xd   :  { %355 = vsyncadd [#allocation6], 4294967040  ;;  %v364_v0 = vmov 0.0   ;;  %v63_v1 = vld [vmem:[#allocation2] sm:$0xff]  ;;  %v64_v2 = vld [vmem:[#allocation2 + $0x8] sm:$0xff]  ;;  %vm122_vm0 = vcmask 1041409  }
   0xe   :  { %61 = vst [vmem:[#allocation8] sm:$0x3] %v364_v0  ;;  %v214_v3 = vmul.f32 -1.442695, %v63_v1  ;;  %v215_v4 = vmul.f32 -1.442695, %v64_v2 }
   0xf   :  { %60 = vst [vmem:[#allocation7] sm:$0x3] %v364_v0  ;;  %v103_v5 = vld [vmem:[#allocation5] sm:$0xff]  ;;  %v104_v6 = vld [vmem:[#allocation5 + $0x8] sm:$0xff]  ;;  %s365_s0 = smov [#allocation8]   ;;  %s183_s29 = sshll.u32 %s414_s3, 4  ;;  %s184_s29 = int_to_ptr.hbm [resolvable:$true] %s183_s29 }
  0x10   :  { %62 = vst [vmem:[#allocation10] sm:$0x3] %v364_v0  ;;  %v147_v7 = vrot.slane %v103_v5, 4  ;;  %224 = vpow2.f32 %v214_v3  ;;  %v153_v8 = vrot.slane %v104_v6, 4  ;;  %s181_s1 = sshll.u32 %s365_s0, 4  ;;  %s366_s30 = smov [#allocation10]   ;;  %s182_s1 = int_to_ptr.vmem [resolvable:$true] %s181_s1 }
  0x11   :  { %226 = vpow2.f32 %v215_v4  ;;  %s192_s5 = sshll.u32 %s366_s30, 4  ;;  %s194_s8 = sshll.u32 %s415_s4, 4  ;;  %s193_s5 = int_to_ptr.vmem [resolvable:$true] %s192_s5  ;;  %s195_s8 = int_to_ptr.hbm [resolvable:$true] %s194_s8 }
  0x12   :  { %v148_v9 = vadd.f32 %v147_v7, %v103_v5  ;;  %v154_v10 = vadd.f32 %v153_v8, %v104_v6  ;;  %s367_s9 = smov [#allocation7]   ;;  %s172_s13 = sshll.u32 %s413_s2, 4  ;;  %s173_s13 = int_to_ptr.hbm [resolvable:$true] %s172_s13 }
  0x13   :  { %s170_s10 = sshll.u32 %s367_s9, 4  ;;  %s171_s10 = int_to_ptr.vmem [resolvable:$true] %s170_s10 }
  0x14   :  { %v149_v11 = vrot.slane %v148_v9, 2  ;;  %v155_v12 = vrot.slane %v154_v10, 2 }
  0x15   :  { %v127_v4 = vld [vmem:[#allocation8] sm:$0x3] }
  0x16   :  { %v150_v13 = vadd.f32 %v149_v11, %v148_v9  ;;  %v225_v14 = vpop.eup %224  ;;  %v156_v15 = vadd.f32 %v155_v12, %v154_v10  ;;  %v105_v9 = vld [vmem:[#allocation7] sm:$0x3] }
  0x17   :  { %v227_v16 = vpop.eup %226  ;;  %v71_v17 = vadd.f32 1.0, %v225_v14  ;;  %v146_v21 = vld [vmem:[#allocation10] sm:$0x3] }
  0x18   :  { %v151_v18 = vrot.slane %v150_v13, 1  ;;  %v72_v19 = vadd.f32 1.0, %v227_v16  ;;  %v157_v20 = vrot.slane %v156_v15, 1 }
  0x19   :  { %228 = vrcp.f32 %v71_v17  ;;  %vm78_vm1 = vweird.f32 %v71_v17  ;;  %v84_v29 = vand.u32 2147483648, %v71_v17  ;;  %v82_v32 = vand.u32 2147483647, %v71_v17 }
  0x1a   :  { %230 = vrcp.f32 %v72_v19  ;;  %v152_v22 = vadd.f32 %v151_v18, %v150_v13  ;;  %v158_v23 = vadd.f32 %v157_v20, %v156_v15  ;;  %v99_v33 = vand.u32 2147483648, %v72_v19 }
  0x1b   :  { %vm93_vm3 = vweird.f32 %v72_v19  ;;  %v97_v35 = vand.u32 2147483647, %v72_v19  ;;  %v85_v37 = vor.u32 1.1754944e-38, %v84_v29  ;;  %vm83_vm6 = vcmp.eq.f32.partialorder %v82_v32, 8.507059e+37 }
  0x1c   :  { %v161_v24 = vsel %vm122_vm0, %v158_v23, %v152_v22  ;;  %v100_v40 = vor.u32 1.1754944e-38, %v99_v33 }
  0x1d   :  { %v163_v25 = vadd.f32 %v161_v24, %v146_v21  ;;  %vm98_vm8 = vcmp.eq.f32.partialorder %v97_v35, 8.507059e+37 }
  0x1f   :  { %v229_v26 = vpop.eup %228  ;;  %164 = vst [vmem:[#allocation10] sm:$0x3] %v163_v25 }
  0x20   :  { %v231_v27 = vpop.eup %230  ;;  %v74_v28 = vmul.f32 %v229_v26, %v71_v17  ;;  %vm79_vm2 = vweird.f32 %v229_v26 }
  0x21   :  { %v89_v30 = vmul.f32 %v231_v27, %v72_v19  ;;  %vm94_vm4 = vweird.f32 %v231_v27  ;;  %vm80_vm5 = vmor %vm78_vm1, %vm79_vm2 }
  0x22   :  { %v75_v31 = vsub.f32 1.0, %v74_v28  ;;  %vm95_vm7 = vmor %vm93_vm3, %vm94_vm4 }
  0x23   :  { %v90_v34 = vsub.f32 1.0, %v89_v30 }
  0x24   :  { %v76_v36 = vmul.f32 %v229_v26, %v75_v31 }
  0x25   :  { %v91_v38 = vmul.f32 %v231_v27, %v90_v34 }
  0x26   :  { %v77_v39 = vadd.f32 %v229_v26, %v76_v36 }
  0x27   :  { %v92_v41 = vadd.f32 %v231_v27, %v91_v38 }
  0x28   :  { %v81_v42 = vsel %vm80_vm5, %v229_v26, %v77_v39 }
  0x29   :  { %v86_v43 = vsel %vm83_vm6, %v85_v37, %v81_v42  ;;  %v96_v44 = vsel %vm95_vm7, %v231_v27, %v92_v41 }
  0x2a   :  { %v101_v45 = vsel %vm98_vm8, %v100_v40, %v96_v44  ;;  %v128_v46 = vrot.slane %v86_v43, 4  ;;  %v106_v47 = vmul.f32 %v103_v5, %v86_v43 }
  0x2b   :  { %v134_v48 = vrot.slane %v101_v45, 4  ;;  %v107_v49 = vmul.f32 %v104_v6, %v101_v45 }
  0x2c   :  { %v129_v50 = vadd.f32 %v128_v46, %v86_v43  ;;  %v108_v51 = vrot.slane %v106_v47, 4 }
  0x2d   :  { %v135_v52 = vadd.f32 %v134_v48, %v101_v45  ;;  %v114_v53 = vrot.slane %v107_v49, 4 }
  0x2e   :  { %v130_v54 = vrot.slane %v129_v50, 2  ;;  %v109_v55 = vadd.f32 %v108_v51, %v106_v47 }
  0x2f   :  { %v136_v56 = vrot.slane %v135_v52, 2  ;;  %v115_v57 = vadd.f32 %v114_v53, %v107_v49 }
  0x30   :  { %v131_v58 = vadd.f32 %v130_v54, %v129_v50  ;;  %v110_v59 = vrot.slane %v109_v55, 2 }
  0x31   :  { %v137_v60 = vadd.f32 %v136_v56, %v135_v52  ;;  %v116_v61 = vrot.slane %v115_v57, 2 }
  0x32   :  { %v132_v62 = vrot.slane %v131_v58, 1  ;;  %v111_v63 = vadd.f32 %v110_v59, %v109_v55 }
  0x33   :  { %v138_v0 = vrot.slane %v137_v60, 1  ;;  %v117_v1 = vadd.f32 %v116_v61, %v115_v57 }
  0x34   :  { %v133_v2 = vadd.f32 %v132_v62, %v131_v58  ;;  %v112_v3 = vrot.slane %v111_v63, 1 }
  0x35   :  { %v139_v5 = vadd.f32 %v138_v0, %v137_v60  ;;  %v118_v6 = vrot.slane %v117_v1, 1 }
  0x36   :  { %v113_v7 = vadd.f32 %v112_v3, %v111_v63 }
  0x37   :  { %v142_v8 = vsel %vm122_vm0, %v139_v5, %v133_v2  ;;  %v119_v10 = vadd.f32 %v118_v6, %v117_v1 }
  0x38   :  { %v144_v11 = vadd.f32 %v142_v8, %v127_v4 }
  0x39   :  { %v123_v12 = vsel %vm122_vm0, %v119_v10, %v113_v7 }
  0x3a   :  { %145 = vst [vmem:[#allocation8] sm:$0x3] %v144_v11  ;;  %v125_v13 = vadd.f32 %v123_v12, %v105_v9 }
  0x3b   :  { %186 = dma.vmem_to_hbm [thread:$0]  %s182_s1, 32, %s184_s29, [#allocation9]  }
  0x3c   :  { %126 = vst [vmem:[#allocation7] sm:$0x3] %v125_v13  ;;  %197 = dma.vmem_to_hbm [thread:$0]  %s193_s5, 32, %s195_s8, [#allocation9]  }
  0x3d   :  { %175 = dma.vmem_to_hbm [thread:$0]  %s171_s10, 32, %s173_s13, [#allocation4]  }
  0x3e   :  { %356 = dma.done.wait [#allocation4], 32  }
  0x3f   :  { %357 = vsyncadd [#allocation4], 4294967264 }
  0x40   :  { %358 = dma.done.wait [#allocation9], 64  }
  0x41   :  { %359 = vsyncadd [#allocation9], 4294967232 }
  0x42   :  { %210 = vsyncpa [#allocation3], 1 }
  0x43   :  { %211 = vsyncpa [#allocation6], 1 }
  0x44   :  { %212 = vsyncpa [#allocation4], 1 }
  0x45   :  { %213 = vsyncpa [#allocation9], 1 }

</bundles_post_ra>
